<compile_context>
chip_gen: v5e
topology: v5e:2x2
jax: 0.10.0
libtpu: 0.0.40
codegen_flags: <defaults>
</compile_context>

<pallas_src>
import functools

import jax
import jax.numpy as jnp
from jax.experimental import pallas as pl
from jax.experimental.pallas import tpu as pltpu


def _irg_loss_kernel(pred_ref, target_ref, pf_ref, tf_ref, out_ref, *,
                     weight_factor, num_features):
    F = num_features
    FB, D = pf_ref.shape                    # static Python ints
    B = FB // F

    # ---- label (logit) MSE ---------------------------------------------------
    p = pred_ref[...].astype(jnp.float32)    # [1, B*C] (lane-dense)
    t = target_ref[...].astype(jnp.float32)
    d = p - t
    label_loss = jnp.sum(d * d) * (1.0 / d.size)

    # ---- diagonal mask, built once as 2D [B,B] (not 3D int32 iotas) ----------
    ii = jax.lax.broadcasted_iota(jnp.int32, (B, B), 0)
    jj = jax.lax.broadcasted_iota(jnp.int32, (B, B), 1)
    off_diag = ii != jj                      # [B, B] bool

    flatten_gram = FB <= 256                 # whole set fits one MXU tile

    def per_set_dists(x_ref):
        """F per-feature [B,B] f32 pairwise-distance matrices for one set."""
        x = x_ref[...]                       # [F*B, D]; native dtype for MXU
        xf = x.astype(jnp.float32)
        # Column- and row-form squared norms from the SAME source: one VPU
        # lane-reduce + one tiny transpose (XLU slot, otherwise idle here).
        sq_col = jnp.sum(xf * xf, axis=-1, keepdims=True)     # [F*B, 1]
        sq_row = jnp.swapaxes(sq_col, 0, 1)                   # [1, F*B]

        if flatten_gram:
            # One MXU matmul for all F Grams (amortizes the per-matmul MXU
            # push/pop F x); trans-B contraction, f32 accumulation.
            g_full = jax.lax.dot_general(
                x, x, (((1,), (1,)), ((), ())),
                preferred_element_type=jnp.float32)            # [F*B, F*B]

        dmats = []
        for f in range(F):                   # static unroll, F is tiny
            lo, hi = f * B, (f + 1) * B
            if flatten_gram:
                g = g_full[lo:hi, lo:hi]                       # [B, B] block
            else:
                xb = x[lo:hi, :]
                g = jax.lax.dot_general(
                    xb, xb, (((1,), (1,)), ((), ())),
                    preferred_element_type=jnp.float32)
            d2 = sq_col[lo:hi, :] + sq_row[:, lo:hi] - 2.0 * g
            # Exact zeros on the diagonal, matching torch.norm(f[:,None]-f).
            dmats.append(jnp.where(off_diag,
                                   jnp.sqrt(jnp.maximum(d2, 0.0)), 0.0))
        return dmats

    pred_d = per_set_dists(pf_ref)
    target_d = per_set_dists(tf_ref)

    sq_err = jnp.float32(0.0)
    for f in range(F):
        diff = pred_d[f] - target_d[f]
        sq_err = sq_err + jnp.sum(diff * diff)
    # sum_f mean_ij(diff_f^2) == sum_f sum(diff_f^2) / (B*B)
    feature_loss = sq_err * (1.0 / (B * B))

    total = ((1.0 - weight_factor) * label_loss
             + (weight_factor / F) * feature_loss)
    out_ref[...] = jnp.reshape(total, (1, 1))   # single final store


def irg_loss_pallas(pred, target, pred_features, target_features,
                    weight_factor=0.8):
    """pred/target: [B, C]; pred_features/target_features: [F, B, D]."""
    F, B, D = pred_features.shape
    # Metadata-only reshapes (row-major contiguous): no extra HBM traffic,
    # unlike the previous concatenate of the two feature stacks.
    pf2d = pred_features.reshape(F * B, D)
    tf2d = target_features.reshape(F * B, D)
    pred_flat = pred.reshape(1, -1)          # lane-dense label operands
    target_flat = target.reshape(1, -1)

    kernel = functools.partial(
        _irg_loss_kernel,
        weight_factor=float(weight_factor),
        num_features=int(F),
    )
    out = pl.pallas_call(
        kernel,
        out_shape=jax.ShapeDtypeStruct((1, 1), jnp.float32),
        # No grid: single invocation, whole arrays resident in VMEM.
        in_specs=[
            pl.BlockSpec(memory_space=pltpu.MemorySpace.VMEM),
            pl.BlockSpec(memory_space=pltpu.MemorySpace.VMEM),
            pl.BlockSpec(memory_space=pltpu.MemorySpace.VMEM),
            pl.BlockSpec(memory_space=pltpu.MemorySpace.VMEM),
        ],
        out_specs=pl.BlockSpec(memory_space=pltpu.MemorySpace.VMEM),
    )(pred_flat, target_flat, pf2d, tf2d)
    return out[0, 0]


def irg_loss_ref(pred, target, pred_features, target_features,
                 weight_factor=0.8):
    """Pure-JAX reference mirroring the PyTorch module."""
    label_loss = jnp.mean((pred - target) ** 2)

    def dist(feat):
        d = feat[:, None, :] - feat[None, :, :]
        return jnp.sqrt(jnp.sum(d * d, axis=-1))

    F = pred_features.shape[0]
    feature_loss = 0.0
    for i in range(F):
        pd = dist(pred_features[i])
        td = dist(target_features[i])
        feature_loss = feature_loss + jnp.mean((pd - td) ** 2)
    return (1.0 - weight_factor) * label_loss + weight_factor * feature_loss / F


if __name__ == "__main__":
    key = jax.random.PRNGKey(0)
    k1, k2, k3, k4 = jax.random.split(key, 4)

    B, C = 8, 1          # batch of scalar predictions
    F, D = 3, 32         # 3 stacked features per sample, 32-dim each

    pred = jax.random.normal(k1, (B, C), dtype=jnp.float32)
    target = jax.random.normal(k2, (B, C), dtype=jnp.float32)
    pred_features = jax.random.normal(k3, (F, B, D), dtype=jnp.float32)
    target_features = jax.random.normal(k4, (F, B, D), dtype=jnp.float32)

    loss = irg_loss_pallas(pred, target, pred_features, target_features,
                           weight_factor=0.8)
    loss = jax.block_until_ready(loss)

    ref = irg_loss_ref(pred, target, pred_features, target_features,
                       weight_factor=0.8)
    assert jnp.allclose(loss, ref, rtol=1e-3, atol=1e-3), (loss, ref)

    print("KERNEL_OK")
</pallas_src>

<mosaic_0001>
module attributes {stable_mosaic.version = 11 : i64} {
  func.func @_irg_loss_kernel(%arg0: memref<1x8xf32, #tpu.memory_space<vmem>>, %arg1: memref<1x8xf32, #tpu.memory_space<vmem>>, %arg2: memref<24x32xf32, #tpu.memory_space<vmem>>, %arg3: memref<24x32xf32, #tpu.memory_space<vmem>>, %arg4: memref<1x1xf32, #tpu.memory_space<vmem>>) attributes {dimension_semantics = [], scalar_prefetch = 0 : i64, scratch_operands = 0 : i64, tpu.core_type = #tpu.core_type<tc>} {
    %c0 = arith.constant 0 : index
    %c0_0 = arith.constant 0 : index
    %0 = vector.load %arg0[%c0, %c0_0] : memref<1x8xf32, #tpu.memory_space<vmem>>, vector<1x8xf32>
    %c0_1 = arith.constant 0 : index
    %c0_2 = arith.constant 0 : index
    %1 = vector.load %arg1[%c0_1, %c0_2] : memref<1x8xf32, #tpu.memory_space<vmem>>, vector<1x8xf32>
    %2 = arith.subf %0, %1 : vector<1x8xf32>
    %3 = arith.mulf %2, %2 : vector<1x8xf32>
    %4 = vector.shape_cast %3 : vector<1x8xf32> to vector<1x1x8xf32>
    %cst = arith.constant dense<0.000000e+00> : vector<1xf32>
    %5 = vector.multi_reduction <add>, %4, %cst [1, 2] : vector<1x1x8xf32> to vector<1xf32>
    %6 = vector.shape_cast %5 : vector<1xf32> to vector<1x1x1xf32>
    %7 = vector.extract %6[0, 0, 0] : f32 from vector<1x1x1xf32>
    %cst_3 = arith.constant 1.250000e-01 : f32
    %8 = arith.mulf %7, %cst_3 : f32
    %9 = tpu.iota {dimensions = array<i32: 0>} : vector<8x8xi32>
    %10 = tpu.iota {dimensions = array<i32: 1>} : vector<8x8xi32>
    %11 = arith.cmpi ne, %9, %10 : vector<8x8xi32>
    %c0_4 = arith.constant 0 : index
    %c0_5 = arith.constant 0 : index
    %12 = vector.load %arg2[%c0_4, %c0_5] : memref<24x32xf32, #tpu.memory_space<vmem>>, vector<24x32xf32>
    %13 = arith.mulf %12, %12 : vector<24x32xf32>
    %cst_6 = arith.constant dense<0.000000e+00> : vector<24xf32>
    %14 = vector.multi_reduction <add>, %13, %cst_6 [1] : vector<24x32xf32> to vector<24xf32>
    %15 = vector.shape_cast %14 : vector<24xf32> to vector<24x1xf32>
    %16 = tpu.transpose %15, [1, 0] : vector<24x1xf32> -> vector<1x24xf32>
    %cst_7 = arith.constant dense<0.000000e+00> : vector<24x24xf32>
    %17 = tpu.matmul %12, %12, %cst_7 {dimension_numbers = #tpu.dot_dimension_numbers<[1], [1], [0], [0], [0, 0, 1, 0], [], []>} : vector<24x32xf32>, vector<24x32xf32>, vector<24x24xf32> -> vector<24x24xf32>
    %18 = vector.extract_strided_slice %17 {offsets = [0, 0], sizes = [8, 8], strides = [1, 1]} : vector<24x24xf32> to vector<8x8xf32>
    %19 = vector.extract_strided_slice %15 {offsets = [0, 0], sizes = [8, 1], strides = [1, 1]} : vector<24x1xf32> to vector<8x1xf32>
    %20 = vector.extract_strided_slice %16 {offsets = [0, 0], sizes = [1, 8], strides = [1, 1]} : vector<1x24xf32> to vector<1x8xf32>
    %21 = vector.broadcast %19 : vector<8x1xf32> to vector<8x8xf32>
    %22 = vector.broadcast %20 : vector<1x8xf32> to vector<8x8xf32>
    %23 = arith.addf %21, %22 : vector<8x8xf32>
    %cst_8 = arith.constant 2.000000e+00 : f32
    %24 = vector.broadcast %cst_8 : f32 to vector<8x8xf32>
    %25 = arith.mulf %24, %18 : vector<8x8xf32>
    %26 = arith.subf %23, %25 : vector<8x8xf32>
    %cst_9 = arith.constant 0.000000e+00 : f32
    %27 = vector.broadcast %cst_9 : f32 to vector<8x8xf32>
    %28 = arith.maximumf %26, %27 : vector<8x8xf32>
    %29 = math.sqrt %28 : vector<8x8xf32>
    %cst_10 = arith.constant 0.000000e+00 : f32
    %30 = vector.broadcast %cst_10 : f32 to vector<8x8xf32>
    %31 = arith.select %11, %29, %30 : vector<8x8xi1>, vector<8x8xf32>
    %32 = vector.extract_strided_slice %17 {offsets = [8, 8], sizes = [8, 8], strides = [1, 1]} : vector<24x24xf32> to vector<8x8xf32>
    %33 = vector.extract_strided_slice %15 {offsets = [8, 0], sizes = [8, 1], strides = [1, 1]} : vector<24x1xf32> to vector<8x1xf32>
    %34 = vector.extract_strided_slice %16 {offsets = [0, 8], sizes = [1, 8], strides = [1, 1]} : vector<1x24xf32> to vector<1x8xf32>
    %35 = vector.broadcast %33 : vector<8x1xf32> to vector<8x8xf32>
    %36 = vector.broadcast %34 : vector<1x8xf32> to vector<8x8xf32>
    %37 = arith.addf %35, %36 : vector<8x8xf32>
    %cst_11 = arith.constant 2.000000e+00 : f32
    %38 = vector.broadcast %cst_11 : f32 to vector<8x8xf32>
    %39 = arith.mulf %38, %32 : vector<8x8xf32>
    %40 = arith.subf %37, %39 : vector<8x8xf32>
    %cst_12 = arith.constant 0.000000e+00 : f32
    %41 = vector.broadcast %cst_12 : f32 to vector<8x8xf32>
    %42 = arith.maximumf %40, %41 : vector<8x8xf32>
    %43 = math.sqrt %42 : vector<8x8xf32>
    %cst_13 = arith.constant 0.000000e+00 : f32
    %44 = vector.broadcast %cst_13 : f32 to vector<8x8xf32>
    %45 = arith.select %11, %43, %44 : vector<8x8xi1>, vector<8x8xf32>
    %46 = vector.extract_strided_slice %17 {offsets = [16, 16], sizes = [8, 8], strides = [1, 1]} : vector<24x24xf32> to vector<8x8xf32>
    %47 = vector.extract_strided_slice %15 {offsets = [16, 0], sizes = [8, 1], strides = [1, 1]} : vector<24x1xf32> to vector<8x1xf32>
    %48 = vector.extract_strided_slice %16 {offsets = [0, 16], sizes = [1, 8], strides = [1, 1]} : vector<1x24xf32> to vector<1x8xf32>
    %49 = vector.broadcast %47 : vector<8x1xf32> to vector<8x8xf32>
    %50 = vector.broadcast %48 : vector<1x8xf32> to vector<8x8xf32>
    %51 = arith.addf %49, %50 : vector<8x8xf32>
    %cst_14 = arith.constant 2.000000e+00 : f32
    %52 = vector.broadcast %cst_14 : f32 to vector<8x8xf32>
    %53 = arith.mulf %52, %46 : vector<8x8xf32>
    %54 = arith.subf %51, %53 : vector<8x8xf32>
    %cst_15 = arith.constant 0.000000e+00 : f32
    %55 = vector.broadcast %cst_15 : f32 to vector<8x8xf32>
    %56 = arith.maximumf %54, %55 : vector<8x8xf32>
    %57 = math.sqrt %56 : vector<8x8xf32>
    %cst_16 = arith.constant 0.000000e+00 : f32
    %58 = vector.broadcast %cst_16 : f32 to vector<8x8xf32>
    %59 = arith.select %11, %57, %58 : vector<8x8xi1>, vector<8x8xf32>
    %c0_17 = arith.constant 0 : index
    %c0_18 = arith.constant 0 : index
    %60 = vector.load %arg3[%c0_17, %c0_18] : memref<24x32xf32, #tpu.memory_space<vmem>>, vector<24x32xf32>
    %61 = arith.mulf %60, %60 : vector<24x32xf32>
    %cst_19 = arith.constant dense<0.000000e+00> : vector<24xf32>
    %62 = vector.multi_reduction <add>, %61, %cst_19 [1] : vector<24x32xf32> to vector<24xf32>
    %63 = vector.shape_cast %62 : vector<24xf32> to vector<24x1xf32>
    %64 = tpu.transpose %63, [1, 0] : vector<24x1xf32> -> vector<1x24xf32>
    %cst_20 = arith.constant dense<0.000000e+00> : vector<24x24xf32>
    %65 = tpu.matmul %60, %60, %cst_20 {dimension_numbers = #tpu.dot_dimension_numbers<[1], [1], [0], [0], [0, 0, 1, 0], [], []>} : vector<24x32xf32>, vector<24x32xf32>, vector<24x24xf32> -> vector<24x24xf32>
    %66 = vector.extract_strided_slice %65 {offsets = [0, 0], sizes = [8, 8], strides = [1, 1]} : vector<24x24xf32> to vector<8x8xf32>
    %67 = vector.extract_strided_slice %63 {offsets = [0, 0], sizes = [8, 1], strides = [1, 1]} : vector<24x1xf32> to vector<8x1xf32>
    %68 = vector.extract_strided_slice %64 {offsets = [0, 0], sizes = [1, 8], strides = [1, 1]} : vector<1x24xf32> to vector<1x8xf32>
    %69 = vector.broadcast %67 : vector<8x1xf32> to vector<8x8xf32>
    %70 = vector.broadcast %68 : vector<1x8xf32> to vector<8x8xf32>
    %71 = arith.addf %69, %70 : vector<8x8xf32>
    %cst_21 = arith.constant 2.000000e+00 : f32
    %72 = vector.broadcast %cst_21 : f32 to vector<8x8xf32>
    %73 = arith.mulf %72, %66 : vector<8x8xf32>
    %74 = arith.subf %71, %73 : vector<8x8xf32>
    %cst_22 = arith.constant 0.000000e+00 : f32
    %75 = vector.broadcast %cst_22 : f32 to vector<8x8xf32>
    %76 = arith.maximumf %74, %75 : vector<8x8xf32>
    %77 = math.sqrt %76 : vector<8x8xf32>
    %cst_23 = arith.constant 0.000000e+00 : f32
    %78 = vector.broadcast %cst_23 : f32 to vector<8x8xf32>
    %79 = arith.select %11, %77, %78 : vector<8x8xi1>, vector<8x8xf32>
    %80 = vector.extract_strided_slice %65 {offsets = [8, 8], sizes = [8, 8], strides = [1, 1]} : vector<24x24xf32> to vector<8x8xf32>
    %81 = vector.extract_strided_slice %63 {offsets = [8, 0], sizes = [8, 1], strides = [1, 1]} : vector<24x1xf32> to vector<8x1xf32>
    %82 = vector.extract_strided_slice %64 {offsets = [0, 8], sizes = [1, 8], strides = [1, 1]} : vector<1x24xf32> to vector<1x8xf32>
    %83 = vector.broadcast %81 : vector<8x1xf32> to vector<8x8xf32>
    %84 = vector.broadcast %82 : vector<1x8xf32> to vector<8x8xf32>
    %85 = arith.addf %83, %84 : vector<8x8xf32>
    %cst_24 = arith.constant 2.000000e+00 : f32
    %86 = vector.broadcast %cst_24 : f32 to vector<8x8xf32>
    %87 = arith.mulf %86, %80 : vector<8x8xf32>
    %88 = arith.subf %85, %87 : vector<8x8xf32>
    %cst_25 = arith.constant 0.000000e+00 : f32
    %89 = vector.broadcast %cst_25 : f32 to vector<8x8xf32>
    %90 = arith.maximumf %88, %89 : vector<8x8xf32>
    %91 = math.sqrt %90 : vector<8x8xf32>
    %cst_26 = arith.constant 0.000000e+00 : f32
    %92 = vector.broadcast %cst_26 : f32 to vector<8x8xf32>
    %93 = arith.select %11, %91, %92 : vector<8x8xi1>, vector<8x8xf32>
    %94 = vector.extract_strided_slice %65 {offsets = [16, 16], sizes = [8, 8], strides = [1, 1]} : vector<24x24xf32> to vector<8x8xf32>
    %95 = vector.extract_strided_slice %63 {offsets = [16, 0], sizes = [8, 1], strides = [1, 1]} : vector<24x1xf32> to vector<8x1xf32>
    %96 = vector.extract_strided_slice %64 {offsets = [0, 16], sizes = [1, 8], strides = [1, 1]} : vector<1x24xf32> to vector<1x8xf32>
    %97 = vector.broadcast %95 : vector<8x1xf32> to vector<8x8xf32>
    %98 = vector.broadcast %96 : vector<1x8xf32> to vector<8x8xf32>
    %99 = arith.addf %97, %98 : vector<8x8xf32>
    %cst_27 = arith.constant 2.000000e+00 : f32
    %100 = vector.broadcast %cst_27 : f32 to vector<8x8xf32>
    %101 = arith.mulf %100, %94 : vector<8x8xf32>
    %102 = arith.subf %99, %101 : vector<8x8xf32>
    %cst_28 = arith.constant 0.000000e+00 : f32
    %103 = vector.broadcast %cst_28 : f32 to vector<8x8xf32>
    %104 = arith.maximumf %102, %103 : vector<8x8xf32>
    %105 = math.sqrt %104 : vector<8x8xf32>
    %cst_29 = arith.constant 0.000000e+00 : f32
    %106 = vector.broadcast %cst_29 : f32 to vector<8x8xf32>
    %107 = arith.select %11, %105, %106 : vector<8x8xi1>, vector<8x8xf32>
    %108 = arith.subf %31, %79 : vector<8x8xf32>
    %109 = arith.mulf %108, %108 : vector<8x8xf32>
    %110 = vector.shape_cast %109 : vector<8x8xf32> to vector<1x8x8xf32>
    %cst_30 = arith.constant dense<0.000000e+00> : vector<1xf32>
    %111 = vector.multi_reduction <add>, %110, %cst_30 [1, 2] : vector<1x8x8xf32> to vector<1xf32>
    %112 = vector.shape_cast %111 : vector<1xf32> to vector<1x1x1xf32>
    %113 = vector.extract %112[0, 0, 0] : f32 from vector<1x1x1xf32>
    %cst_31 = arith.constant 0.000000e+00 : f32
    %114 = arith.addf %cst_31, %113 : f32
    %115 = arith.subf %45, %93 : vector<8x8xf32>
    %116 = arith.mulf %115, %115 : vector<8x8xf32>
    %117 = vector.shape_cast %116 : vector<8x8xf32> to vector<1x8x8xf32>
    %cst_32 = arith.constant dense<0.000000e+00> : vector<1xf32>
    %118 = vector.multi_reduction <add>, %117, %cst_32 [1, 2] : vector<1x8x8xf32> to vector<1xf32>
    %119 = vector.shape_cast %118 : vector<1xf32> to vector<1x1x1xf32>
    %120 = vector.extract %119[0, 0, 0] : f32 from vector<1x1x1xf32>
    %121 = arith.addf %114, %120 : f32
    %122 = arith.subf %59, %107 : vector<8x8xf32>
    %123 = arith.mulf %122, %122 : vector<8x8xf32>
    %124 = vector.shape_cast %123 : vector<8x8xf32> to vector<1x8x8xf32>
    %cst_33 = arith.constant dense<0.000000e+00> : vector<1xf32>
    %125 = vector.multi_reduction <add>, %124, %cst_33 [1, 2] : vector<1x8x8xf32> to vector<1xf32>
    %126 = vector.shape_cast %125 : vector<1xf32> to vector<1x1x1xf32>
    %127 = vector.extract %126[0, 0, 0] : f32 from vector<1x1x1xf32>
    %128 = arith.addf %121, %127 : f32
    %cst_34 = arith.constant 1.562500e-02 : f32
    %129 = arith.mulf %128, %cst_34 : f32
    %cst_35 = arith.constant 2.000000e-01 : f32
    %130 = arith.mulf %cst_35, %8 : f32
    %cst_36 = arith.constant 0.266666681 : f32
    %131 = arith.mulf %cst_36, %129 : f32
    %132 = arith.addf %130, %131 : f32
    %133 = vector.broadcast %132 : f32 to vector<1x1xf32>
    %c0_37 = arith.constant 0 : index
    %c0_38 = arith.constant 0 : index
    %134 = vector.load %arg4[%c0_37, %c0_38] : memref<1x1xf32, #tpu.memory_space<vmem>>, vector<1x1xf32>
    tpu.vector_store %arg4[%c0_37, %c0_38], %133 {strides = array<i32>} : memref<1x1xf32, #tpu.memory_space<vmem>>, vector<1x1xf32>,
    return
  }
}

</mosaic_0001>

<bundles_post_ra>
// kernel: tpu_custom_call.1
= control target key start
LH: loop header
LB: loop body
LE: loop exit
PB: predicated region body
PF: predicated region fallthrough
CT: control target
= control target key end

     0   :  { %9 = vsyncpa [#allocation3], 0  ;;  %s762_s0 = inlined_call_operand.hbm [shape: f32[1,8], index: 0, kind: input, shape index: {}]   ;;  %s763_s1 = inlined_call_operand.hbm [shape: f32[1,8], index: 1, kind: input, shape index: {}]   ;;  %s764_s2 = inlined_call_operand.hbm [shape: f32[24,32], index: 2, kind: input, shape index: {}]   ;;  %s765_s3 = inlined_call_operand.hbm [shape: f32[24,32], index: 3, kind: input, shape index: {}]   ;;  %s766_s4 = inlined_call_operand.hbm [shape: f32[1,1], index: 4, kind: output, shape index: {}]  }
   0x1   :  { %10 = vsyncpa [#allocation6], 0 }
   0x2   :  { %11 = vsyncpa [#allocation9], 0  ;;  %s29_s17 = sshll.u32 %s763_s1, 4  ;;  %s30_s17 = int_to_ptr.hbm [resolvable:$true] %s29_s17 }
   0x3   :  { %12 = vsyncpa [#allocation4], 0  ;;  %s625_s18 = smov [#allocation5]   ;;  %s18_s22 = sshll.u32 %s762_s0, 4  ;;  %s19_s22 = int_to_ptr.hbm [resolvable:$true] %s18_s22 }
   0x4   :  { %s31_s19 = sshll.u32 %s625_s18, 4  ;;  %s626_s23 = smov [#allocation2]   ;;  %s32_s19 = int_to_ptr.vmem [resolvable:$true] %s31_s19 }
   0x5   :  { %34 = dma.hbm_to_vmem [thread:$0]  %s30_s17, 16, %s32_s19, [#allocation6]  }
   0x6   :  { %s20_s24 = sshll.u32 %s626_s23, 4  ;;  %s39_s27 = sshll.u32 %s764_s2, 4  ;;  %s21_s24 = int_to_ptr.vmem [resolvable:$true] %s20_s24  ;;  %s40_s27 = int_to_ptr.hbm [resolvable:$true] %s39_s27 }
   0x7   :  { %23 = dma.hbm_to_vmem [thread:$0]  %s19_s22, 16, %s21_s24, [#allocation3]  }
   0x8   :  { %s627_s1 = smov [#allocation7]   ;;  %s52_s5 = sshll.u32 %s765_s3, 4  ;;  %s53_s5 = int_to_ptr.hbm [resolvable:$true] %s52_s5 }
   0x9   :  { %s41_s28 = sshll.u32 %s627_s1, 4  ;;  %s628_s6 = smov 128   ;;  %s42_s28 = int_to_ptr.vmem [resolvable:$true] %s41_s28 }
   0xa   :  { %s629_s0 = smov 8   ;;  %s630_s7 = smov [#allocation8]  }
   0xb   :  { %47 = dma.hbm_to_vmem [thread:$0]  %s40_s27, 384, %s42_s28, [#allocation6], %s628_s6, %s628_s6, %s629_s0  }
   0xc   :  { %s54_s8 = sshll.u32 %s630_s7, 4  ;;  %s55_s8 = int_to_ptr.vmem [resolvable:$true] %s54_s8 }
   0xd   :  { %60 = dma.hbm_to_vmem [thread:$0]  %s53_s5, 384, %s55_s8, [#allocation9], %s628_s6, %s628_s6, %s629_s0  }
   0xe   :  { %617 = dma.done.wait [#allocation3], 16  }
   0xf   :  { %618 = vsyncadd [#allocation3], 4294967280 }
  0x10   :  { %619 = dma.done.wait [#allocation6], 400  }
  0x11   :  { %620 = vsyncadd [#allocation6], 4294966896 }
  0x12   :  { %621 = dma.done.wait [#allocation9], 384  }
  0x13   :  { %622 = vsyncadd [#allocation9], 4294966912  ;;  %v98_v0 = vld [vmem:[#allocation7] sm:$0xff]  ;;  %vm104_vm0 = vcmask 261120   ;;  %v99_v1 = vld [vmem:[#allocation7 + $0x8] sm:$0xff]  ;;  %s631_s2 = smov 120  }
  0x14   :  { %v101_v2 = vmul.f32 %v98_v0, %v98_v0  ;;  %v102_v3 = vmul.f32 %v99_v1, %v99_v1  ;;  %v100_v4 = vld [vmem:[#allocation7 + $0x10] sm:$0xff]  ;;  %v243_v5 = vld [vmem:[#allocation8 + $0x10] sm:$0xff]  ;;  %v241_v6 = vld [vmem:[#allocation8] sm:$0xff]  ;;  %vm385_vm10 = vcmask 64512   ;;  %s632_s3 = smov 112   ;;  %vm81_vm15 = vcmask 57344  }
  0x15   :  { %v103_v7 = vmul.f32 %v100_v4, %v100_v4  ;;  %v242_v8 = vld [vmem:[#allocation8 + $0x8] sm:$0xff]  ;;  %461 = vmatpush.xpose.msk.msra.mxu2 %vm104_vm0, %v100_v4  ;;  %464 = vmatpush.xpose.msk.msra.mxu3 %vm104_vm0, %v243_v5  ;;  %v244_v12 = vmul.f32 %v241_v6, %v241_v6  ;;  %v246_v14 = vmul.f32 %v243_v5, %v243_v5  ;;  %s437_s20 = sshll.u32 %s766_s4, 4  ;;  %s633_s22 = smov [#allocation10]   ;;  %s438_s20 = int_to_ptr.hbm [resolvable:$true] %s437_s20 }
  0x16   :  { %v105_v9 = vsel %vm104_vm0, %v101_v2, 0.0  ;;  %v108_v10 = vsel %vm104_vm0, %v102_v3, 0.0  ;;  %449 = vmatpush.xpose.msk.msra.mxu0 %vm104_vm0, %v100_v4  ;;  %455 = vmatpush.xpose.msk.msra.mxu1 %vm104_vm0, %v243_v5  ;;  %v245_v13 = vmul.f32 %v242_v8, %v242_v8  ;;  %s435_s23 = sshll.u32 %s633_s22, 4  ;;  %s436_s23 = int_to_ptr.vmem [resolvable:$true] %s435_s23 }
  0x17   :  { %106 = vadd.xlane.f32.xlu0 %v105_v9  ;;  %109 = vadd.xlane.f32.xlu1 %v108_v10  ;;  %v111_v11 = vsel %vm104_vm0, %v103_v7, 0.0  ;;  %v247_v15 = vsel %vm104_vm0, %v244_v12, 0.0  ;;  %v253_v17 = vsel %vm104_vm0, %v246_v14, 0.0 }
  0x18   :  { %112 = vadd.xlane.f32.xlu2 %v111_v11  ;;  %v250_v16 = vsel %vm104_vm0, %v245_v13, 0.0 }
  0x19   :  { %462 = vmatpush.xpose.msk.msra.mxu2 %vm104_vm0, %v99_v1  ;;  %465 = vmatpush.xpose.msk.msra.mxu3 %vm104_vm0, %v242_v8 }
  0x1a   :  { %450 = vmatpush.xpose.msk.msra.mxu0 %vm104_vm0, %v99_v1  ;;  %456 = vmatpush.xpose.msk.msra.mxu1 %vm104_vm0, %v242_v8 }
  0x1d   :  { %463 = vmatpush.xpose.msk.msra.mxu2 %vm104_vm0, %v98_v0  ;;  %466 = vmatpush.xpose.msk.msra.mxu3 %vm104_vm0, %v241_v6 }
  0x1e   :  { %451 = vmatpush.xpose.msk.msra.mxu0 %vm104_vm0, %v98_v0  ;;  %457 = vmatpush.xpose.msk.msra.mxu1 %vm104_vm0, %v241_v6 }
  0x1f   :  { %248 = vadd.xlane.f32.xlu0 %v247_v15  ;;  %251 = vadd.xlane.f32.xlu1 %v250_v16 }
  0x20   :  { %254 = vadd.xlane.f32.xlu2 %v253_v17  ;;  %453 = vmatmul.msk.f32.vlgmr.msra.gmra.mxu2 %vm104_vm0, %v99_v1 }
  0x21   :  { %459 = vmatmul.msk.f32.vlgmr.msra.gmra.mxu3 %vm104_vm0, %v242_v8  ;;  %452 = vmatmul.msk.f32.vlgmr.msra.gmra.mxu0 %vm104_vm0, %v98_v0 }
  0x22   :  { %458 = vmatmul.msk.f32.vlgmr.msra.gmra.mxu1 %vm104_vm0, %v241_v6 }
  0x28   :  { %454 = vmatmul.msk.f32.gmra.mxu2 %vm104_vm0, %v100_v4  ;;  %v93_v4 = vlaneseq }
  0x29   :  { %460 = vmatmul.msk.f32.gmra.mxu3 %vm104_vm0, %v243_v5  ;;  %vm428_vm0 = vcmask 0  }
  0x2a   :  { %v94_v15 = vshrl.u32 %v93_v4, 7 }
  0x8a   :  { %v107_v18 = vpop.xlane.xlu0 %106  ;;  %v110_v19 = vpop.xlane.xlu1 %109 }
  0x8b   :  { %114 = vxpose.xlu0.b32.start [1/3] (short) (narrow) %v107_v18, 8  ;;  %v113_v21 = vpop.xlane.xlu2 %112 }
  0x92   :  { %v249_v20 = vpop.xlane.xlu0 %248  ;;  %v252_v22 = vpop.xlane.xlu1 %251 }
  0x93   :  { %115 = vxpose.xlu0.b32.cont [2/3] (short) (narrow) %v110_v19, 8  ;;  %256 = vxpose.xlu1.b32.start [1/3] (short) (narrow) %v249_v20, 8  ;;  %v255_v23 = vpop.xlane.xlu2 %254 }
  0x9b   :  { %116 = vxpose.xlu0.b32.end [3/3] (short) (narrow) %v113_v21, 8  ;;  %257 = vxpose.xlu1.b32.cont [2/3] (short) (narrow) %v252_v22, 8 }
  0x9e   :  { %v172_v26 = vpop.f32.mrf.mxu0 }
  0x9f   :  { %v183_v31 = vmul.f32 2.0, %v172_v26  ;;  %v314_v39 = vpop.f32.mrf.mxu1  ;;  %v96_v26 = vand.u32 127, %v93_v4 }
  0xa0   :  { %v325_v47 = vmul.f32 2.0, %v314_v39 }
  0xa1   :  { %vm718_vm4 = vcmp.ne.s32.totalorder %v94_v15, %v96_v26 }
  0xa3   :  { %258 = vxpose.xlu1.b32.end [3/3] (short) (narrow) %v255_v23, 8  ;;  %v175_v24 = vpop.f32.mrf.mxu2 }
  0xa4   :  { %v317_v25 = vpop.f32.mrf.mxu3  ;;  %v200_v29 = vmul.f32 2.0, %v175_v24 }
  0xa5   :  { %v342_v44 = vmul.f32 2.0, %v317_v25 }
  0xab   :  { %v178_v27 = vpop.f32.mrf.mxu2 }
  0xac   :  { %v221_v32 = vmul.f32 2.0, %v178_v27  ;;  %v320_v40 = vpop.f32.mrf.mxu3 }
  0xad   :  { %v363_v48 = vmul.f32 2.0, %v320_v40 }
 0x12f   :  { %v130_v28 = vpop.trf.xlu0 }
 0x130   :  { %v181_v30 = vperm.slane %v130_v28, 0 }
 0x132   :  { %v199_v33 = vadd.f32 %v181_v30, %v110_v19  ;;  %v182_v34 = vadd.f32 %v181_v30, %v107_v18  ;;  %v220_v35 = vadd.f32 %v181_v30, %v113_v21 }
 0x134   :  { %v201_v36 = vsub.f32 %v199_v33, %v200_v29  ;;  %v184_v37 = vsub.f32 %v182_v34, %v183_v31  ;;  %v222_v38 = vsub.f32 %v220_v35, %v221_v32 }
 0x136   :  { %v202_v41 = vmax.f32 %v201_v36, 0.0  ;;  %v695_v42 = vmax.f32 %v184_v37, 0.0  ;;  %v697_v43 = vmax.f32 %v222_v38, 0.0 }
 0x137   :  { %v272_v45 = vpop.trf.xlu1 }
 0x138   :  { %485 = vrsqrt.f32 %v695_v42  ;;  %v323_v46 = vperm.slane %v272_v45, 0  ;;  %vm210_vm1 = vcmp.eq.f32.partialorder %v202_v41, inf  ;;  %v213_v21 = vand.u32 2147483648, %v202_v41 }
 0x139   :  { %487 = vrsqrt.f32 %v202_v41  ;;  %vm212_vm2 = vcmp.eq.f32.partialorder %v202_v41, 0.0  ;;  %vm193_vm3 = vcmp.eq.f32.partialorder %v695_v42, inf  ;;  %v196_v36 = vand.u32 2147483648, %v695_v42 }
 0x13a   :  { %v341_v49 = vadd.f32 %v323_v46, %v252_v22  ;;  %v324_v50 = vadd.f32 %v323_v46, %v249_v20  ;;  %v362_v51 = vadd.f32 %v323_v46, %v255_v23  ;;  %489 = vrsqrt.f32 %v697_v43 }
 0x13b   :  { %vm195_vm5 = vcmp.eq.f32.partialorder %v695_v42, 0.0  ;;  %vm231_vm11 = vcmp.eq.f32.partialorder %v697_v43, inf  ;;  %vm233_vm12 = vcmp.eq.f32.partialorder %v697_v43, 0.0 }
 0x13c   :  { %v343_v52 = vsub.f32 %v341_v49, %v342_v44  ;;  %v326_v53 = vsub.f32 %v324_v50, %v325_v47  ;;  %v364_v54 = vsub.f32 %v362_v51, %v363_v48 }
 0x13e   :  { %v486_v55 = vpop.eup %485  ;;  %v701_v56 = vmax.f32 %v343_v52, 0.0  ;;  %v703_v57 = vmax.f32 %v326_v53, 0.0  ;;  %v705_v59 = vmax.f32 %v364_v54, 0.0 }
 0x13f   :  { %v488_v58 = vpop.eup %487  ;;  %v187_v60 = vmul.f32 %v486_v55, %v695_v42 }
 0x140   :  { %491 = vrsqrt.f32 %v703_v57  ;;  %v204_v61 = vmul.f32 %v488_v58, %v202_v41  ;;  %v490_v62 = vpop.eup %489  ;;  %vm335_vm6 = vcmp.eq.f32.partialorder %v703_v57, inf  ;;  %v338_v38 = vand.u32 2147483648, %v703_v57 }
 0x141   :  { %493 = vrsqrt.f32 %v701_v56  ;;  %v188_v63 = vmul.f32 %v486_v55, %v187_v60  ;;  %v225_v1 = vmul.f32 %v490_v62, %v697_v43  ;;  %vm352_vm7 = vcmp.eq.f32.partialorder %v701_v56, inf }
 0x142   :  { %v205_v0 = vmul.f32 %v488_v58, %v204_v61  ;;  %495 = vrsqrt.f32 %v705_v59  ;;  %v355_v45 = vand.u32 2147483648, %v701_v56  ;;  %vm337_vm8 = vcmp.eq.f32.partialorder %v703_v57, 0.0 }
 0x143   :  { %v189_v2 = vmul.f32 0.5, %v188_v63  ;;  %v226_v8 = vmul.f32 %v490_v62, %v225_v1  ;;  %vm354_vm9 = vcmp.eq.f32.partialorder %v701_v56, 0.0  ;;  %vm373_vm13 = vcmp.eq.f32.partialorder %v705_v59, inf  ;;  %v77_v1 = vld [vmem:[#allocation2] sm:$0x1] }
 0x144   :  { %v206_v3 = vmul.f32 0.5, %v205_v0  ;;  %v376_v63 = vand.u32 2147483648, %v705_v59  ;;  %vm375_vm14 = vcmp.eq.f32.partialorder %v705_v59, 0.0 }
 0x145   :  { %v190_v5 = vsub.f32 1.5, %v189_v2  ;;  %v227_v19 = vmul.f32 0.5, %v226_v8  ;;  %v78_v2 = vld [vmem:[#allocation5] sm:$0x1] }
 0x146   :  { %v492_v6 = vpop.eup %491  ;;  %v207_v7 = vsub.f32 1.5, %v206_v3  ;;  %v79_v3 = vsub.f32 %v77_v1, %v78_v2 }
 0x147   :  { %v494_v9 = vpop.eup %493  ;;  %v191_v10 = vmul.f32 %v486_v55, %v190_v5  ;;  %v329_v11 = vmul.f32 %v492_v6, %v703_v57  ;;  %v228_v30 = vsub.f32 1.5, %v227_v19 }
 0x148   :  { %v208_v12 = vmul.f32 %v488_v58, %v207_v7  ;;  %v346_v13 = vmul.f32 %v494_v9, %v701_v56  ;;  %v496_v14 = vpop.eup %495  ;;  %v234_v58 = vand.u32 2147483648, %v697_v43  ;;  %v80_v4 = vmul.f32 %v79_v3, %v79_v3 }
 0x149   :  { %v330_v16 = vmul.f32 %v492_v6, %v329_v11  ;;  %v367_v20 = vmul.f32 %v496_v14, %v705_v59  ;;  %v192_v22 = vmul.f32 %v191_v10, %v695_v42 }
 0x14a   :  { %v209_v17 = vmul.f32 %v208_v12, %v202_v41  ;;  %v347_v18 = vmul.f32 %v494_v9, %v346_v13 }
 0x14b   :  { %v331_v23 = vmul.f32 0.5, %v330_v16  ;;  %v368_v31 = vmul.f32 %v496_v14, %v367_v20  ;;  %v194_v32 = vsel %vm193_vm3, %v695_v42, %v192_v22 }
 0x14c   :  { %v211_v24 = vsel %vm210_vm1, %v202_v41, %v209_v17  ;;  %v348_v25 = vmul.f32 0.5, %v347_v18  ;;  %v197_v40 = vsel %vm195_vm5, %v196_v36, %v194_v32  ;;  %v229_v41 = vmul.f32 %v490_v62, %v228_v30 }
 0x14d   :  { %v214_v27 = vsel %vm212_vm2, %v213_v21, %v211_v24  ;;  %v332_v28 = vsub.f32 1.5, %v331_v23  ;;  %v369_v44 = vmul.f32 0.5, %v368_v31  ;;  %v198_v49 = vsel %vm718_vm4, %v197_v40, 0.0 }
 0x14e   :  { %216 = vrot.lane.b32.xlu2 %v214_v27, %s631_s2  ;;  %v349_v29 = vsub.f32 1.5, %v348_v25  ;;  %v230_v52 = vmul.f32 %v229_v41, %v697_v43 }
 0x14f   :  { %v333_v33 = vmul.f32 %v492_v6, %v332_v28  ;;  %v370_v53 = vsub.f32 1.5, %v369_v44 }
 0x150   :  { %v350_v34 = vmul.f32 %v494_v9, %v349_v29 }
 0x151   :  { %v334_v37 = vmul.f32 %v333_v33, %v703_v57 }
 0x152   :  { %v351_v39 = vmul.f32 %v350_v34, %v701_v56 }
 0x153   :  { %v336_v46 = vsel %vm335_vm6, %v703_v57, %v334_v37  ;;  %v371_v57 = vmul.f32 %v496_v14, %v370_v53 }
 0x154   :  { %v353_v42 = vsel %vm352_vm7, %v701_v56, %v351_v39  ;;  %v339_v47 = vsel %vm337_vm8, %v338_v38, %v336_v46  ;;  %v232_v56 = vsel %vm231_vm11, %v697_v43, %v230_v52  ;;  %v82_v43 = vsel %vm81_vm15, %v80_v4, 0.0 }
 0x155   :  { %v356_v48 = vsel %vm354_vm9, %v355_v45, %v353_v42  ;;  %v340_v50 = vsel %vm718_vm4, %v339_v47, 0.0  ;;  %v235_v60 = vsel %vm233_vm12, %v234_v58, %v232_v56  ;;  %v372_v61 = vmul.f32 %v371_v57, %v705_v59 }
 0x156   :  { %358 = vrot.lane.b32.xlu2 %v356_v48, %s631_s2  ;;  %v383_v51 = vsub.f32 %v198_v49, %v340_v50 }
 0x157   :  { %v374_v62 = vsel %vm373_vm13, %v705_v59, %v372_v61 }
 0x158   :  { %v384_v54 = vmul.f32 %v383_v51, %v383_v51  ;;  %v377_v0 = vsel %vm375_vm14, %v376_v63, %v374_v62 }
 0x15a   :  { %v386_v55 = vsel %vm385_vm10, %v384_v54, 0.0 }
 0x15b   :  { %387 = vadd.xlane.f32.xlu0 %v386_v55 }
 0x15e   :  { %237 = vrot.lane.b32.xlu2 %v235_v60, %s632_s3 }
 0x166   :  { %379 = vrot.lane.b32.xlu2 %v377_v0, %s632_s3 }
 0x18f   :  { %83 = vadd.xlane.f32.xlu2 %v82_v43 }
 0x1a8   :  { %v217_v5 = vpop.permute.xlu2 %216 }
 0x1a9   :  { %v219_v7 = vsel %vm718_vm4, %v217_v5, 0.0 }
 0x1b0   :  { %v359_v6 = vpop.permute.xlu2 %358 }
 0x1b1   :  { %v361_v8 = vsel %vm718_vm4, %v359_v6, 0.0 }
 0x1b2   :  { %v397_v9 = vsub.f32 %v219_v7, %v361_v8 }
 0x1b4   :  { %v398_v10 = vmul.f32 %v397_v9, %v397_v9 }
 0x1b6   :  { %v399_v59 = vsel %vm385_vm10, %v398_v10, 0.0 }
 0x1b7   :  { %400 = vadd.xlane.f32.xlu1 %v399_v59 }
 0x1b8   :  { %v238_v11 = vpop.permute.xlu2 %237 }
 0x1b9   :  { %v240_v13 = vsel %vm718_vm4, %v238_v11, 0.0 }
 0x1c0   :  { %v380_v12 = vpop.permute.xlu2 %379 }
 0x1c1   :  { %v382_v14 = vsel %vm718_vm4, %v380_v12, 0.0 }
 0x1c2   :  { %v410_v15 = vsub.f32 %v240_v13, %v382_v14 }
 0x1c4   :  { %v411_v16 = vmul.f32 %v410_v15, %v410_v15 }
 0x1c6   :  { %v412_v17 = vsel %vm385_vm10, %v411_v16, 0.0 }
 0x1c7   :  { %413 = vadd.xlane.f32.xlu2 %v412_v17 }
 0x1ce   :  { %v388_v18 = vpop.xlane.xlu0 %387 }
 0x1cf   :  { %v389_v19 = vrot.slane %v388_v18, 4 }
 0x1d1   :  { %v390_v20 = vadd.f32 %v389_v19, %v388_v18 }
 0x1d3   :  { %v391_v21 = vrot.slane %v390_v20, 2 }
 0x1d5   :  { %v392_v25 = vadd.f32 %v391_v21, %v390_v20 }
 0x1d7   :  { %v393_v28 = vrot.slane %v392_v25, 1 }
 0x1d9   :  { %v394_v31 = vadd.f32 %v393_v28, %v392_v25 }
 0x202   :  { %v84_v22 = vpop.xlane.xlu2 %83 }
 0x203   :  { %v85_v23 = vrot.slane %v84_v22, 4 }
 0x205   :  { %v86_v24 = vadd.f32 %v85_v23, %v84_v22 }
 0x207   :  { %v87_v26 = vrot.slane %v86_v24, 2 }
 0x209   :  { %v88_v27 = vadd.f32 %v87_v26, %v86_v24 }
 0x20b   :  { %v89_v29 = vrot.slane %v88_v27, 1 }
 0x20d   :  { %v90_v30 = vadd.f32 %v89_v29, %v88_v27 }
 0x20f   :  { %467 = vpush %v90_v30 }
 0x210   :  { %469 = vpush %v394_v31 }
 0x22a   :  { %v401_v32 = vpop.xlane.xlu1 %400 }
 0x22b   :  { %v402_v33 = vrot.slane %v401_v32, 4 }
 0x22d   :  { %v403_v34 = vadd.f32 %v402_v33, %v401_v32 }
 0x22f   :  { %v404_v35 = vrot.slane %v403_v34, 2 }
 0x231   :  { %v405_v36 = vadd.f32 %v404_v35, %v403_v34 }
 0x233   :  { %v406_v37 = vrot.slane %v405_v36, 1 }
 0x235   :  { %v407_v38 = vadd.f32 %v406_v37, %v405_v36 }
 0x237   :  { %471 = vpush %v407_v38 }
 0x23a   :  { %v414_v39 = vpop.xlane.xlu2 %413 }
 0x23b   :  { %v415_v40 = vrot.slane %v414_v39, 4 }
 0x23d   :  { %v416_v41 = vadd.f32 %v415_v40, %v414_v39 }
 0x23f   :  { %v417_v44 = vrot.slane %v416_v41, 2 }
 0x240   :  { %s468_s9 = spop %467 }
 0x241   :  { %v418_v45 = vadd.f32 %v417_v44, %v416_v41  ;;  %s470_s10 = spop %469  ;;  %s92_s13 = smul.f32 0.125, %s468_s9 }
 0x243   :  { %v419_v46 = vrot.slane %v418_v45, 1  ;;  %s424_s17 = smul.f32 0.2, %s92_s13 }
 0x245   :  { %v420_v42 = vadd.f32 %v419_v46, %v418_v45 }
 0x247   :  { %473 = vpush %v420_v42 }
 0x268   :  { %s472_s11 = spop %471 }
 0x269   :  { %s409_s12 = sadd.f32 %s472_s11, %s470_s10 }
 0x278   :  { %s474_s14 = spop %473 }
 0x279   :  { %s422_s15 = sadd.f32 %s474_s14, %s409_s12 }
 0x27b   :  { %s423_s16 = smul.f32 0.015625, %s422_s15 }
 0x27d   :  { %s425_s21 = smul.f32 0.26666668, %s423_s16 }
 0x27f   :  { %s426_s24 = sadd.f32 %s425_s21, %s424_s17 }
 0x281   :  { %v427_v47 = vstv %s426_s24 }
 0x282   :  { %429 = vst.msk [vmem:[#allocation10] sm:$0x1] %vm428_vm0, %v427_v47 }
 0x283   :  { %440 = dma.vmem_to_hbm [thread:$0]  %s436_s23, 16, %s438_s20, [#allocation4]  }
 0x284   :  { %623 = dma.done.wait [#allocation4], 16  }
 0x285   :  { %624 = vsyncadd [#allocation4], 4294967280 }
 0x286   :  { %445 = vsyncpa [#allocation3], 1 }
 0x287   :  { %446 = vsyncpa [#allocation6], 1 }
 0x288   :  { %447 = vsyncpa [#allocation9], 1 }
 0x289   :  { %448 = vsyncpa [#allocation4], 1 }

</bundles_post_ra>
